<compile_context>
chip_gen: v7x
topology: tpu7x:2x2x1
jax: 0.10.0
libtpu: 0.0.40
codegen_flags: <defaults>
</compile_context>

<pallas_src>
import jax
import jax.numpy as jnp
from jax.experimental import pallas as pl
from jax.experimental.pallas import tpu as pltpu


# ---------------------------------------------------------------------------
# Fused Pallas kernel
# ---------------------------------------------------------------------------
def _gated(h):
    # tanh(h) * sigmoid(h) with a single transcendental:
    #   t = exp(-|h|)  ->  tanh(h)*sigmoid(h) = (1 - t) / (1 + t^2)     for h >= 0
    #                                           (t^2 - t) / (1 + t^2)   for h <  0
    t = jnp.exp(-jnp.abs(h))
    tt = t * t
    num = jnp.where(h >= 0, 1.0, tt) - t
    return num * pl.reciprocal(1.0 + tt, approx=True)


def _make_block_kernel(L, dilations, sc_flags):
    """Fused WaveNet block: all layers for one batch element per grid step."""

    def kernel(*refs):
        x_ref, o_ref = refs[0], refs[-1]
        wrefs = refs[1:-1]

        x = x_ref[0].astype(jnp.float32)          # (C, L) activation, resident in VMEM
        ri = 0
        for d, has_sc in zip(dilations, sc_flags):
            w_ref, b_ref = wrefs[ri], wrefs[ri + 1]
            if has_sc:
                scw_ref, scb_ref = wrefs[ri + 2], wrefs[ri + 3]
                ri += 4
            else:
                ri += 2

            C = x.shape[0]
            # d-shifted taps; the SAME halo is an in-kernel zero block (no HBM padding pass).
            if d < L:
                z = jnp.zeros((C, d), jnp.float32)
                t0 = jnp.concatenate([z, x[:, :L - d]], axis=1)   # x[:, l - d]
                t2 = jnp.concatenate([x[:, d:], z], axis=1)       # x[:, l + d]
            else:
                t0 = jnp.zeros_like(x)
                t2 = jnp.zeros_like(x)

            # Dilated conv (k=3) as three MXU matmuls: bf16 in, f32 accumulate.
            # BatchNorm scale is pre-folded into w; only the bias add remains.
            x_bf = x.astype(jnp.bfloat16)
            acc = jnp.dot(w_ref[0], t0.astype(jnp.bfloat16),
                          preferred_element_type=jnp.float32)
            acc = acc + jnp.dot(w_ref[1], x_bf,
                                preferred_element_type=jnp.float32)
            acc = acc + jnp.dot(w_ref[2], t2.astype(jnp.bfloat16),
                                preferred_element_type=jnp.float32)
            h = acc + b_ref[...]                  # (C_out, L) + (C_out, 1)

            g = _gated(h)                         # gated activation (one exp + approx recip)

            if has_sc:                            # parameterized shortcut: 1x1 conv + folded BN
                res = jnp.dot(scw_ref[...], x_bf,
                              preferred_element_type=jnp.float32) + scb_ref[...]
            else:
                res = x                           # identity residual
            x = g + res                           # (C_out, L), stays in VMEM for next layer

        o_ref[0] = x.astype(o_ref.dtype)

    return kernel


def wavenet_block_pallas(x, params):
    """x: (N, C_in, L) float32, PyTorch NCL layout -> (N, C_out, L) float32."""
    N, C_in, L = x.shape
    C_out = params[0]["w"].shape[1]
    dilations = [int(p["dilation"]) for p in params]
    sc_flags = ["sc_w" in p for p in params]

    def _const_spec(shape):
        nd = len(shape)
        return pl.BlockSpec(shape, lambda n, _nd=nd: (0,) * _nd)

    inputs = [x.astype(jnp.bfloat16)]             # activations shipped in bf16 (halved HBM read)
    in_specs = [pl.BlockSpec((1, C_in, L), lambda n: (n, 0, 0))]
    for p, has_sc in zip(params, sc_flags):
        w = p["w"].astype(jnp.bfloat16)           # (3, C_out, C), BN scale folded in
        inputs += [w, p["b"]]
        in_specs += [_const_spec(w.shape), _const_spec(p["b"].shape)]
        if has_sc:
            inputs += [p["sc_w"].astype(jnp.bfloat16), p["sc_b"]]
            in_specs += [_const_spec(p["sc_w"].shape), _const_spec(p["sc_b"].shape)]

    kernel = _make_block_kernel(L, dilations, sc_flags)
    return pl.pallas_call(
        kernel,
        out_shape=jax.ShapeDtypeStruct((N, C_out, L), jnp.float32),
        grid_spec=pltpu.PrefetchScalarGridSpec(
            num_scalar_prefetch=0,
            grid=(N,),                            # one batch element per grid step
            in_specs=in_specs,
            out_specs=pl.BlockSpec((1, C_out, L), lambda n: (n, 0, 0)),
        ),
        compiler_params=pltpu.CompilerParams(
            dimension_semantics=("parallel",),    # independent batch steps (megacore sharding)
            vmem_limit_bytes=32 * 1024 * 1024,
        ),
    )(*inputs)


# ---------------------------------------------------------------------------
# Deterministic parameter construction (eval-mode BN folded into weights/bias)
# ---------------------------------------------------------------------------
def init_block_params(key, in_channels, out_channels, block_size, eps=1e-5):
    params = []
    for i in range(block_size):
        cin = in_channels if i == 0 else out_channels
        d = 2 ** i
        key, k1, k2, k3, k4, k5, k6, k7, k8, k9, k10 = jax.random.split(key, 11)
        w = jax.random.normal(k1, (3, out_channels, cin), jnp.float32) / jnp.sqrt(3.0 * cin)
        gamma = 1.0 + 0.1 * jax.random.normal(k2, (out_channels,), jnp.float32)
        beta = 0.1 * jax.random.normal(k3, (out_channels,), jnp.float32)
        mean = 0.1 * jax.random.normal(k4, (out_channels,), jnp.float32)
        var = 1.0 + 0.1 * jnp.abs(jax.random.normal(k5, (out_channels,), jnp.float32))
        scale = gamma / jnp.sqrt(var + eps)
        p = {
            "w": w * scale[None, :, None],        # BN scale folded into conv weight
            "b": (beta - mean * scale)[:, None],  # (C_out, 1)
            "dilation": d,
        }
        if cin != out_channels:                   # parameterized shortcut (1x1 conv + BN)
            sc_w = jax.random.normal(k6, (out_channels, cin), jnp.float32) / jnp.sqrt(float(cin))
            g2 = 1.0 + 0.1 * jax.random.normal(k7, (out_channels,), jnp.float32)
            b2 = 0.1 * jax.random.normal(k8, (out_channels,), jnp.float32)
            m2 = 0.1 * jax.random.normal(k9, (out_channels,), jnp.float32)
            v2 = 1.0 + 0.1 * jnp.abs(jax.random.normal(k10, (out_channels,), jnp.float32))
            sc_scale = g2 / jnp.sqrt(v2 + eps)
            p["sc_w"] = sc_w * sc_scale[:, None]
            p["sc_b"] = (b2 - m2 * sc_scale)[:, None]
        params.append(p)
    return params


# ---------------------------------------------------------------------------
# Pure-JAX reference (same eval-mode semantics, full f32) for verification
# ---------------------------------------------------------------------------
def wavenet_block_ref(x, params):
    for p in params:
        d = int(p["dilation"])
        w = jnp.transpose(p["w"], (1, 2, 0))      # (C_out, C_in, 3) "OIW"
        h = jax.lax.conv_general_dilated(
            x, w, window_strides=(1,), padding=[(d, d)], rhs_dilation=(d,),
            dimension_numbers=("NCW", "OIW", "NCW"))
        h = h + p["b"][None]
        g = jnp.tanh(h) * jax.nn.sigmoid(h)
        if "sc_w" in p:
            res = jnp.einsum("oc,ncl->nol", p["sc_w"], x) + p["sc_b"][None]
        else:
            res = x
        x = g + res
    return x


if __name__ == "__main__":
    key = jax.random.PRNGKey(0)
    N, C_in, C_out, L, block_size = 2, 4, 8, 16, 2

    key, kx = jax.random.split(key)
    x = jax.random.normal(kx, (N, C_in, L), jnp.float32)   # PyTorch NCL layout
    params = init_block_params(key, C_in, C_out, block_size)

    out = jax.block_until_ready(wavenet_block_pallas(x, params))
    ref = wavenet_block_ref(x, params)

    assert out.shape == (N, C_out, L), out.shape
    # bf16 MXU operands + approx-reciprocal gate -> compare at a bf16-justified tolerance,
    # normalized by the output scale.
    scale = float(jnp.maximum(1.0, jnp.max(jnp.abs(ref))))
    err = float(jnp.max(jnp.abs(out - ref))) / scale
    assert err < 5e-2, f"mismatch vs reference: {err}"
    print("KERNEL_OK")
</pallas_src>

<mosaic_0001>
module attributes {stable_mosaic.version = 11 : i64} {
  func.func @kernel(%arg0: i32, %arg1: memref<1x4x16xbf16, #tpu.memory_space<vmem>>, %arg2: memref<3x8x4xbf16, #tpu.memory_space<vmem>>, %arg3: memref<8x1xf32, #tpu.memory_space<vmem>>, %arg4: memref<8x4xbf16, #tpu.memory_space<vmem>>, %arg5: memref<8x1xf32, #tpu.memory_space<vmem>>, %arg6: memref<3x8x8xbf16, #tpu.memory_space<vmem>>, %arg7: memref<8x1xf32, #tpu.memory_space<vmem>>, %arg8: memref<1x8x16xf32, #tpu.memory_space<vmem>>) attributes {dimension_semantics = [#tpu.dimension_semantics<parallel>], iteration_bounds = array<i64: 2>, scalar_prefetch = 0 : i64, scratch_operands = 0 : i64, tpu.core_type = #tpu.core_type<tc>, window_params = [{transform_indices = @transform_0, window_bounds = array<i64: 1, 4, 16>}, {pipeline_mode = #tpu.pipeline_mode<synchronous>, transform_indices = @transform_1, window_bounds = array<i64: 3, 8, 4>}, {pipeline_mode = #tpu.pipeline_mode<synchronous>, transform_indices = @transform_2, window_bounds = array<i64: 8, 1>}, {pipeline_mode = #tpu.pipeline_mode<synchronous>, transform_indices = @transform_3, window_bounds = array<i64: 8, 4>}, {pipeline_mode = #tpu.pipeline_mode<synchronous>, transform_indices = @transform_4, window_bounds = array<i64: 8, 1>}, {pipeline_mode = #tpu.pipeline_mode<synchronous>, transform_indices = @transform_5, window_bounds = array<i64: 3, 8, 8>}, {pipeline_mode = #tpu.pipeline_mode<synchronous>, transform_indices = @transform_6, window_bounds = array<i64: 8, 1>}, {transform_indices = @transform_7, window_bounds = array<i64: 1, 8, 16>}]} {
    %c0 = arith.constant 0 : index
    %c0_0 = arith.constant 0 : index
    %c0_1 = arith.constant 0 : index
    %0 = vector.load %arg1[%c0, %c0_0, %c0_1] : memref<1x4x16xbf16, #tpu.memory_space<vmem>>, vector<1x4x16xbf16>
    %1 = vector.shape_cast %0 : vector<1x4x16xbf16> to vector<4x16xbf16>
    %2 = arith.extf %1 : vector<4x16xbf16> to vector<4x16xf32>
    %cst = arith.constant 0.000000e+00 : f32
    %3 = vector.broadcast %cst : f32 to vector<4x1xf32>
    %4 = vector.extract_strided_slice %2 {offsets = [0, 0], sizes = [4, 15], strides = [1, 1]} : vector<4x16xf32> to vector<4x15xf32>
    %5 = tpu.concatenate %3, %4 in 1 : vector<4x1xf32>, vector<4x15xf32> -> vector<4x16xf32>
    %6 = vector.extract_strided_slice %2 {offsets = [0, 1], sizes = [4, 15], strides = [1, 1]} : vector<4x16xf32> to vector<4x15xf32>
    %7 = tpu.concatenate %6, %3 in 1 : vector<4x15xf32>, vector<4x1xf32> -> vector<4x16xf32>
    %8 = arith.truncf %2 : vector<4x16xf32> to vector<4x16xbf16>
    %c0_2 = arith.constant 0 : index
    %c0_3 = arith.constant 0 : index
    %c0_4 = arith.constant 0 : index
    %9 = vector.load %arg2[%c0_2, %c0_3, %c0_4] : memref<3x8x4xbf16, #tpu.memory_space<vmem>>, vector<1x8x4xbf16>
    %10 = vector.shape_cast %9 : vector<1x8x4xbf16> to vector<8x4xbf16>
    %11 = arith.truncf %5 : vector<4x16xf32> to vector<4x16xbf16>
    %cst_5 = arith.constant dense<0.000000e+00> : vector<8x16xf32>
    %12 = tpu.matmul %10, %11, %cst_5 {dimension_numbers = #tpu.dot_dimension_numbers<[1], [0], [0], [1], [0, 0, 1, 1], [], []>} : vector<8x4xbf16>, vector<4x16xbf16>, vector<8x16xf32> -> vector<8x16xf32>
    %c1 = arith.constant 1 : index
    %c0_6 = arith.constant 0 : index
    %c0_7 = arith.constant 0 : index
    %13 = vector.load %arg2[%c1, %c0_6, %c0_7] : memref<3x8x4xbf16, #tpu.memory_space<vmem>>, vector<1x8x4xbf16>
    %14 = vector.shape_cast %13 : vector<1x8x4xbf16> to vector<8x4xbf16>
    %cst_8 = arith.constant dense<0.000000e+00> : vector<8x16xf32>
    %15 = tpu.matmul %14, %8, %cst_8 {dimension_numbers = #tpu.dot_dimension_numbers<[1], [0], [0], [1], [0, 0, 1, 1], [], []>} : vector<8x4xbf16>, vector<4x16xbf16>, vector<8x16xf32> -> vector<8x16xf32>
    %16 = arith.addf %12, %15 : vector<8x16xf32>
    %c2 = arith.constant 2 : index
    %c0_9 = arith.constant 0 : index
    %c0_10 = arith.constant 0 : index
    %17 = vector.load %arg2[%c2, %c0_9, %c0_10] : memref<3x8x4xbf16, #tpu.memory_space<vmem>>, vector<1x8x4xbf16>
    %18 = vector.shape_cast %17 : vector<1x8x4xbf16> to vector<8x4xbf16>
    %19 = arith.truncf %7 : vector<4x16xf32> to vector<4x16xbf16>
    %cst_11 = arith.constant dense<0.000000e+00> : vector<8x16xf32>
    %20 = tpu.matmul %18, %19, %cst_11 {dimension_numbers = #tpu.dot_dimension_numbers<[1], [0], [0], [1], [0, 0, 1, 1], [], []>} : vector<8x4xbf16>, vector<4x16xbf16>, vector<8x16xf32> -> vector<8x16xf32>
    %21 = arith.addf %16, %20 : vector<8x16xf32>
    %c0_12 = arith.constant 0 : index
    %c0_13 = arith.constant 0 : index
    %22 = vector.load %arg3[%c0_12, %c0_13] : memref<8x1xf32, #tpu.memory_space<vmem>>, vector<8x1xf32>
    %23 = vector.broadcast %22 : vector<8x1xf32> to vector<8x16xf32>
    %24 = arith.addf %21, %23 : vector<8x16xf32>
    %25 = math.absf %24 : vector<8x16xf32>
    %cst_14 = arith.constant 0.000000e+00 : f32
    %26 = vector.broadcast %cst_14 : f32 to vector<8x16xf32>
    %27 = arith.subf %26, %25 : vector<8x16xf32>
    %28 = math.exp %27 : vector<8x16xf32>
    %29 = arith.mulf %28, %28 : vector<8x16xf32>
    %cst_15 = arith.constant 0.000000e+00 : f32
    %30 = vector.broadcast %cst_15 : f32 to vector<8x16xf32>
    %31 = arith.cmpf oge, %24, %30 : vector<8x16xf32>
    %cst_16 = arith.constant 1.000000e+00 : f32
    %32 = vector.broadcast %cst_16 : f32 to vector<8x16xf32>
    %33 = arith.select %31, %32, %29 : vector<8x16xi1>, vector<8x16xf32>
    %34 = arith.subf %33, %28 : vector<8x16xf32>
    %cst_17 = arith.constant 1.000000e+00 : f32
    %35 = vector.broadcast %cst_17 : f32 to vector<8x16xf32>
    %36 = arith.addf %35, %29 : vector<8x16xf32>
    %37 = tpu.reciprocal %36 {approx = true} : vector<8x16xf32> -> vector<8x16xf32>
    %38 = arith.mulf %34, %37 : vector<8x16xf32>
    %c0_18 = arith.constant 0 : index
    %c0_19 = arith.constant 0 : index
    %39 = vector.load %arg4[%c0_18, %c0_19] : memref<8x4xbf16, #tpu.memory_space<vmem>>, vector<8x4xbf16>
    %cst_20 = arith.constant dense<0.000000e+00> : vector<8x16xf32>
    %40 = tpu.matmul %39, %8, %cst_20 {dimension_numbers = #tpu.dot_dimension_numbers<[1], [0], [0], [1], [0, 0, 1, 1], [], []>} : vector<8x4xbf16>, vector<4x16xbf16>, vector<8x16xf32> -> vector<8x16xf32>
    %c0_21 = arith.constant 0 : index
    %c0_22 = arith.constant 0 : index
    %41 = vector.load %arg5[%c0_21, %c0_22] : memref<8x1xf32, #tpu.memory_space<vmem>>, vector<8x1xf32>
    %42 = vector.broadcast %41 : vector<8x1xf32> to vector<8x16xf32>
    %43 = arith.addf %40, %42 : vector<8x16xf32>
    %44 = arith.addf %38, %43 : vector<8x16xf32>
    %cst_23 = arith.constant 0.000000e+00 : f32
    %45 = vector.broadcast %cst_23 : f32 to vector<8x2xf32>
    %46 = vector.extract_strided_slice %44 {offsets = [0, 0], sizes = [8, 14], strides = [1, 1]} : vector<8x16xf32> to vector<8x14xf32>
    %47 = tpu.concatenate %45, %46 in 1 : vector<8x2xf32>, vector<8x14xf32> -> vector<8x16xf32>
    %48 = vector.extract_strided_slice %44 {offsets = [0, 2], sizes = [8, 14], strides = [1, 1]} : vector<8x16xf32> to vector<8x14xf32>
    %49 = tpu.concatenate %48, %45 in 1 : vector<8x14xf32>, vector<8x2xf32> -> vector<8x16xf32>
    %50 = arith.truncf %44 : vector<8x16xf32> to vector<8x16xbf16>
    %c0_24 = arith.constant 0 : index
    %c0_25 = arith.constant 0 : index
    %c0_26 = arith.constant 0 : index
    %51 = vector.load %arg6[%c0_24, %c0_25, %c0_26] : memref<3x8x8xbf16, #tpu.memory_space<vmem>>, vector<1x8x8xbf16>
    %52 = vector.shape_cast %51 : vector<1x8x8xbf16> to vector<8x8xbf16>
    %53 = arith.truncf %47 : vector<8x16xf32> to vector<8x16xbf16>
    %cst_27 = arith.constant dense<0.000000e+00> : vector<8x16xf32>
    %54 = tpu.matmul %52, %53, %cst_27 {dimension_numbers = #tpu.dot_dimension_numbers<[1], [0], [0], [1], [0, 0, 1, 1], [], []>} : vector<8x8xbf16>, vector<8x16xbf16>, vector<8x16xf32> -> vector<8x16xf32>
    %c1_28 = arith.constant 1 : index
    %c0_29 = arith.constant 0 : index
    %c0_30 = arith.constant 0 : index
    %55 = vector.load %arg6[%c1_28, %c0_29, %c0_30] : memref<3x8x8xbf16, #tpu.memory_space<vmem>>, vector<1x8x8xbf16>
    %56 = vector.shape_cast %55 : vector<1x8x8xbf16> to vector<8x8xbf16>
    %cst_31 = arith.constant dense<0.000000e+00> : vector<8x16xf32>
    %57 = tpu.matmul %56, %50, %cst_31 {dimension_numbers = #tpu.dot_dimension_numbers<[1], [0], [0], [1], [0, 0, 1, 1], [], []>} : vector<8x8xbf16>, vector<8x16xbf16>, vector<8x16xf32> -> vector<8x16xf32>
    %58 = arith.addf %54, %57 : vector<8x16xf32>
    %c2_32 = arith.constant 2 : index
    %c0_33 = arith.constant 0 : index
    %c0_34 = arith.constant 0 : index
    %59 = vector.load %arg6[%c2_32, %c0_33, %c0_34] : memref<3x8x8xbf16, #tpu.memory_space<vmem>>, vector<1x8x8xbf16>
    %60 = vector.shape_cast %59 : vector<1x8x8xbf16> to vector<8x8xbf16>
    %61 = arith.truncf %49 : vector<8x16xf32> to vector<8x16xbf16>
    %cst_35 = arith.constant dense<0.000000e+00> : vector<8x16xf32>
    %62 = tpu.matmul %60, %61, %cst_35 {dimension_numbers = #tpu.dot_dimension_numbers<[1], [0], [0], [1], [0, 0, 1, 1], [], []>} : vector<8x8xbf16>, vector<8x16xbf16>, vector<8x16xf32> -> vector<8x16xf32>
    %63 = arith.addf %58, %62 : vector<8x16xf32>
    %c0_36 = arith.constant 0 : index
    %c0_37 = arith.constant 0 : index
    %64 = vector.load %arg7[%c0_36, %c0_37] : memref<8x1xf32, #tpu.memory_space<vmem>>, vector<8x1xf32>
    %65 = vector.broadcast %64 : vector<8x1xf32> to vector<8x16xf32>
    %66 = arith.addf %63, %65 : vector<8x16xf32>
    %67 = math.absf %66 : vector<8x16xf32>
    %cst_38 = arith.constant 0.000000e+00 : f32
    %68 = vector.broadcast %cst_38 : f32 to vector<8x16xf32>
    %69 = arith.subf %68, %67 : vector<8x16xf32>
    %70 = math.exp %69 : vector<8x16xf32>
    %71 = arith.mulf %70, %70 : vector<8x16xf32>
    %cst_39 = arith.constant 0.000000e+00 : f32
    %72 = vector.broadcast %cst_39 : f32 to vector<8x16xf32>
    %73 = arith.cmpf oge, %66, %72 : vector<8x16xf32>
    %cst_40 = arith.constant 1.000000e+00 : f32
    %74 = vector.broadcast %cst_40 : f32 to vector<8x16xf32>
    %75 = arith.select %73, %74, %71 : vector<8x16xi1>, vector<8x16xf32>
    %76 = arith.subf %75, %70 : vector<8x16xf32>
    %cst_41 = arith.constant 1.000000e+00 : f32
    %77 = vector.broadcast %cst_41 : f32 to vector<8x16xf32>
    %78 = arith.addf %77, %71 : vector<8x16xf32>
    %79 = tpu.reciprocal %78 {approx = true} : vector<8x16xf32> -> vector<8x16xf32>
    %80 = arith.mulf %76, %79 : vector<8x16xf32>
    %81 = arith.addf %80, %44 : vector<8x16xf32>
    %c0_42 = arith.constant 0 : index
    %c0_43 = arith.constant 0 : index
    %c0_44 = arith.constant 0 : index
    %82 = vector.load %arg8[%c0_42, %c0_43, %c0_44] : memref<1x8x16xf32, #tpu.memory_space<vmem>>, vector<1x8x16xf32>
    %83 = vector.shape_cast %82 : vector<1x8x16xf32> to vector<8x16xf32>
    %84 = vector.shape_cast %81 : vector<8x16xf32> to vector<1x8x16xf32>
    tpu.vector_store %arg8[%c0_42, %c0_43, %c0_44], %84 {strides = array<i32>} : memref<1x8x16xf32, #tpu.memory_space<vmem>>, vector<1x8x16xf32>,
    return
  }
  func.func @transform_0(%arg0: i32) -> (i32, i32, i32) {
    %c0_i32 = arith.constant 0 : i32
    %c0_i32_0 = arith.constant 0 : i32
    %c0_i32_1 = arith.constant 0 : i32
    return %arg0, %c0_i32, %c0_i32_0 : i32, i32, i32
  }
  func.func @transform_1(%arg0: i32) -> (i32, i32, i32) {
    %c0_i32 = arith.constant 0 : i32
    %c0_i32_0 = arith.constant 0 : i32
    %c0_i32_1 = arith.constant 0 : i32
    %c0_i32_2 = arith.constant 0 : i32
    return %c0_i32, %c0_i32_0, %c0_i32_1 : i32, i32, i32
  }
  func.func @transform_2(%arg0: i32) -> (i32, i32) {
    %c0_i32 = arith.constant 0 : i32
    %c0_i32_0 = arith.constant 0 : i32
    %c0_i32_1 = arith.constant 0 : i32
    return %c0_i32, %c0_i32_0 : i32, i32
  }
  func.func @transform_3(%arg0: i32) -> (i32, i32) {
    %c0_i32 = arith.constant 0 : i32
    %c0_i32_0 = arith.constant 0 : i32
    %c0_i32_1 = arith.constant 0 : i32
    return %c0_i32, %c0_i32_0 : i32, i32
  }
  func.func @transform_4(%arg0: i32) -> (i32, i32) {
    %c0_i32 = arith.constant 0 : i32
    %c0_i32_0 = arith.constant 0 : i32
    %c0_i32_1 = arith.constant 0 : i32
    return %c0_i32, %c0_i32_0 : i32, i32
  }
  func.func @transform_5(%arg0: i32) -> (i32, i32, i32) {
    %c0_i32 = arith.constant 0 : i32
    %c0_i32_0 = arith.constant 0 : i32
    %c0_i32_1 = arith.constant 0 : i32
    %c0_i32_2 = arith.constant 0 : i32
    return %c0_i32, %c0_i32_0, %c0_i32_1 : i32, i32, i32
  }
  func.func @transform_6(%arg0: i32) -> (i32, i32) {
    %c0_i32 = arith.constant 0 : i32
    %c0_i32_0 = arith.constant 0 : i32
    %c0_i32_1 = arith.constant 0 : i32
    return %c0_i32, %c0_i32_0 : i32, i32
  }
  func.func @transform_7(%arg0: i32) -> (i32, i32, i32) {
    %c0_i32 = arith.constant 0 : i32
    %c0_i32_0 = arith.constant 0 : i32
    %c0_i32_1 = arith.constant 0 : i32
    return %arg0, %c0_i32, %c0_i32_0 : i32, i32, i32
  }
}

</mosaic_0001>

<bundles_post_ra>
// kernel: tpu_custom_call.1
= control target key start
LH: loop header
LB: loop body
LE: loop exit
PB: predicated region body
PF: predicated region fallthrough
CT: control target
= control target key end

     0   :  { %12 = vsyncpa [#allocation3], 0  ;;  %s1175_s0 = inlined_call_operand.vmem [shape: bf16[2,4,16], index: 0, kind: input, shape index: {}]   ;;  %s1176_s1 = inlined_call_operand.vmem [shape: bf16[3,8,4], index: 1, kind: input, shape index: {}]   ;;  %s1177_s2 = inlined_call_operand.vmem [shape: f32[8,1], index: 2, kind: input, shape index: {}]   ;;  %s1178_s3 = inlined_call_operand.vmem [shape: bf16[8,4], index: 3, kind: input, shape index: {}]   ;;  %s1179_s4 = inlined_call_operand.vmem [shape: f32[8,1], index: 4, kind: input, shape index: {}]   ;;  %s1180_s5 = inlined_call_operand.vmem [shape: bf16[3,8,8], index: 5, kind: input, shape index: {}]   ;;  %s1181_s6 = inlined_call_operand.vmem [shape: f32[8,1], index: 6, kind: input, shape index: {}]   ;;  %s1182_s7 = inlined_call_operand.hbm [shape: f32[2,8,16], index: 7, kind: output, shape index: {}]  }
   0x1   :  { %14 = vsyncpa [#allocation3 + $0x1], 0  ;;  %s1004_s24 = smov 0   ;;  %s1006_s25 = smov 0  }
   0x2   :  { %s1008_s26 = smov 0   ;;  %s1010_s27 = smov 0  }
   0x3 LB: > { %s1025_s28 = sadd.s32 4294967295, %s954_s27   ;;  %s759_s29 = sadd.s32 4294967294, %s954_s27   ;;  %s954_s27 = sphi %s1010_s27, %s1188_s27   ;;  %s950_s26 = sphi %s1008_s26, %s1187_s26   ;;  %s946_s25 = sphi %s1006_s25, %s1186_s25   ;;  %s942_s24 = sphi %s1004_s24, %s1185_s24  }
   0x4   : > { %s1029_s30 = sadd.s32 1, %s954_s27   ;;  %s179_s8 = sadd.s32 1, %s950_s26 }
   0x5   : > { %s176_s9 = ssub.s32 %s954_s27, %s1029_s30  ;;  %p189_p0 = scmp.ne.s32.totalorder %s950_s26, %s946_s25 }
   0x6   : > { %p177_p1 = scmp.eq.s32.totalorder %s176_s9, 0  ;;  %p190_p2 = scmp.eq.s32.totalorder %s1025_s28, 1 }
   0x7   : > { %p195_p3 = scmp.ne.s32.totalorder %s946_s25, %s942_s24  ;;  %p196_p4 = scmp.eq.s32.totalorder %s759_s29, 1 }
   0x8   : > { %s1040_s10 = scalar_select %p177_p1, %s950_s26, %s179_s8  }
   0x9   : > { %p1042_p5 = por %p190_p2, %p189_p0  ;;  %p1046_p6 = por %p196_p4, %p195_p3 }
   0xa   : > { %p762_p7 = scmp.ge.s32.totalorder %s954_s27, 1  ;;  %p239_p8 = scmp.lt.s32.totalorder %s954_s27, 3 }
   0xc   : > { %p240_p9 = pnand %p762_p7, %p239_p8 }
   0xd   : > { %p270_p10 = scmp.lt.s32.totalorder (!%p240_p9), %s1025_s28, 1  ;;  %v956_v0 = vmov (!%p240_p9), 0.0   ;;  %vm957_vm0 = vmmov (!%p240_p9), 0   ;;  %vm296_vm1 = vcmask (!%p240_p9), 1041408   ;;  %v765_v4 = vld [vmem:[%s1176_s1 + $0x4] sm:$0xf] (!%p240_p9) }
   0xe   : > { %243 = sbr.rel (%p240_p9) target bundleno = 796 (0x31c), region = 48  ;;  %794 = vmatprep.subr.bf16.mxu0 (!%p240_p9), %v956_v0  ;;  %796 = vmatprep.mubr.msk.bf16.mxu0 (!%p240_p9), %vm957_vm0, %v956_v0  ;;  %vm292_vm2 = vcmask (!%p240_p9), 31744   ;;  %s958_s20 = smov (!%p240_p9), 1   ;;  %v436_v5 = vld [vmem:[%s1177_s2] sm:$0xff] (!%p240_p9)  ;;  %v959_v6 = vmov (!%p240_p9), 0   ;;  %vm281_vm3 = vcmask (!%p240_p9), 7168  }
   0xf   : > { %800 = vmatprep.subr.bf16.mxu1 (!%p240_p9), %v956_v0  ;;  %802 = vmatprep.mubr.msk.bf16.mxu1 (!%p240_p9), %vm957_vm0, %v956_v0  ;;  %s960_s23 = smov (!%p240_p9), 127   ;;  %v455_v7 = vld [vmem:[%s1179_s4] sm:$0xff] (!%p240_p9)  ;;  %vm286_vm4 = vcmask (!%p240_p9), 121856   ;;  %v768_v17 = vld [vmem:[%s1176_s1 + $0x8] sm:$0xf] (!%p240_p9)  ;;  %vm525_vm6 = vcmask (!%p240_p9), 1043456  }
  0x10   : > { %882 = vset.pattern.permute.xlu1 (!%p240_p9), %v959_v6  ;;  %883 = vset.pattern.permute.xlu0 (!%p240_p9), %v959_v6  ;;  %v288_v14 = vld [vmem:[%s1176_s1] sm:$0xf] (!%p240_p9)  ;;  %s961_s18 = smov (!%p240_p9), 126   ;;  %s962_s19 = smov (!%p240_p9), 2   ;;  %v771_v55 = vld [vmem:[%s1180_s5 + $0x4] sm:$0xf] (!%p240_p9) }
  0x11   : > { %439 = vperm.xlu1 (!%p240_p9), %882, %v436_v5   ;;  %v454_v18 = vld [vmem:[%s1178_s3] sm:$0xf] (!%p240_p9)  ;;  %vm521_vm7 = vcmask (!%p240_p9), 64512   ;;  %vm514_vm8 = vcmask (!%p240_p9), 113664   ;;  %vm509_vm9 = vcmask (!%p240_p9), 15360   ;;  %s777_s16 = sshll.u32 (!%p240_p9), %s1025_s28, 7 }
  0x12   : > { %v665_v53 = vld [vmem:[%s1181_s6] sm:$0xff] (!%p240_p9)  ;;  %vm684_vm11 = vcmask (!%p240_p9), 130048   ;;  %s1133_s21 = scalar_lea.hbm (!%p240_p9), %s1182_s7, %s777_s16 }
  0x15   : > { %s271_s13 = scalar_select %p270_p10, %s1025_s28, 1  ;;  %458 = vperm.xlu1 %882, %v455_v7  }
  0x16   : > { %s963_s28 = smov [#allocation2]  }
  0x17   : > { %s764_s14 = sshll.u32 %s271_s13, 1  ;;  %s896_s29 = sshll.u32 %s963_s28, 4  ;;  %s897_s29 = int_to_ptr.vmem [resolvable:$false] %s896_s29 }
  0x18   : > { %s273_s17 = scalar_lea.vmem %s1175_s0, %s764_s14  ;;  %s267_s14 = sand.u32 1, %s946_s25  }
  0x19   : > { %v275_v1 = vld [vmem:[%s273_s17] sm:$0x3]  ;;  %s763_s15 = sshll.u32 %s267_s14, 3  ;;  %s687_s22 = scalar_lea.sflag [#allocation3], %s267_s14 }
  0x1a   : > { %v276_v2 = vunpack.c.l.bf16 %v275_v1  ;;  %v298_v3 = vsel %vm296_vm1, %v275_v1, 0  ;;  %v517_v1 = vld [vmem:[%s1180_s5] sm:$0xf]  ;;  %s269_s17 = scalar_lea.vmem [#allocation2], %s763_s15  ;;  %s898_s8 = scalar_lea.vmem %s897_s29, 256 }
  0x1b   : > { %795 = vmatpush3.bf16.msra.mxu0 %v298_v3 }
  0x1c   : > { %278 = vrot.lane.b32.xlu0 %v276_v2, %s958_s20  ;;  %806 = vmatprep.subr.bf16.mxu0 %v956_v0 }
  0x1e   : > { %797 = vmatmul.mubr.msk.bf16.vlgmr.msra.gmra.mrb[0].mxu0 %vm292_vm2, %v765_v4 }
  0x1f   : > { %808 = vmatprep.mubr.msk.bf16.mxu0 %vm957_vm0, %v956_v0 }
  0x20   : > { %283 = vrot.lane.b32.xlu0 %v276_v2, %s960_s23 }
  0x8e   : > { %v279_v8 = vpop.permute.xlu0 %278 }
  0x8f   : > { %v282_v9 = vsel %vm281_vm3, 0.0, %v279_v8 }
  0x90   : > { %v289_v10 = vpack.c.bf16 %v282_v9, %v282_v9  ;;  %v440_v31 = vpop.permute.xlu1 %439 }
  0x92   : > { %v284_v11 = vpop.permute.xlu0 %283  ;;  %v344_v12 = vsel %vm296_vm1, %v289_v10, 0 }
  0x93   : > { %v287_v13 = vsel %vm286_vm4, %v284_v11, 0.0  ;;  %801 = vmatpush3.bf16.msra.mxu1 %v344_v12 }
  0x94   : > { %v388_v15 = vpack.c.bf16 %v287_v13, %v287_v13  ;;  %812 = vmatprep.subr.bf16.mxu1 %v956_v0  ;;  %v459_v48 = vpop.permute.xlu1 %458 }
  0x96   : > { %v393_v16 = vsel %vm296_vm1, %v388_v15, 0  ;;  %803 = vmatmul.mubr.msk.bf16.vlgmr.msra.gmra.mrb[0].mxu1 %vm292_vm2, %v288_v14 }
  0x97   : > { %807 = vmatpush3.bf16.msra.mxu0 %v393_v16  ;;  %813 = vmatpush3.bf16.msra.mxu1 %v298_v3 }
  0x98   : > { %814 = vmatprep.mubr.msk.bf16.mxu1 %vm957_vm0, %v956_v0  ;;  %818 = vmatprep.subr.bf16.mxu0 %v956_v0 }
  0x99   : > { %824 = vmatprep.subr.bf16.mxu1 %v956_v0 }
  0x9a   : > { %809 = vmatmul.mubr.msk.bf16.vlgmr.msra.gmra.mrb[4].mxu0 %vm292_vm2, %v768_v17 }
  0x9b   : > { %820 = vmatprep.mubr.msk.bf16.mxu0 %vm957_vm0, %v956_v0 }
  0x9e   : > { %815 = vmatmul.mubr.msk.bf16.vlgmr.msra.gmra.mrb[4].mxu1 %vm292_vm2, %v454_v18 }
  0x9f   : > { %826 = vmatprep.mubr.msk.bf16.mxu1 %vm957_vm0, %v956_v0 }
  0xf1   : > { %v334_v19 = vpop.f32.mrb[0].mxu0 }
  0xf2   : > { %v798_v20 = vpop.f32.mrb[1].mxu0 }
  0xf3   : > { %v337_v21 = vpop.f32.mrb[2].mxu0 }
  0xf4   : > { %v799_v22 = vpop.f32.mrb[3].mxu0 }
 0x169   : > { %v380_v23 = vpop.f32.mrb[0].mxu1 }
 0x16a   : > { %v381_v24 = vadd.f32 %v380_v23, %v334_v19  ;;  %v804_v25 = vpop.f32.mrb[1].mxu1 }
 0x16b   : > { %v383_v26 = vpop.f32.mrb[2].mxu1 }
 0x16c   : > { %v805_v27 = vpop.f32.mrb[3].mxu1 }
 0x16d   : > { %v429_v28 = vpop.f32.mrb[4].mxu0 }
 0x16e   : > { %v435_v29 = vadd.f32 %v429_v28, %v381_v24  ;;  %v810_v30 = vpop.f32.mrb[5].mxu0 }
 0x16f   : > { %v432_v32 = vpop.f32.mrb[6].mxu0 }
 0x170   : > { %v442_v33 = vadd.f32 %v440_v31, %v435_v29  ;;  %v811_v34 = vpop.f32.mrb[7].mxu0 }
 0x171   : > { %v498_v35 = vpop.f32.mrb[4].mxu1 }
 0x172   : > { %v443_v36 = vand.u32 2147483647, %v442_v33  ;;  %v816_v37 = vpop.f32.mrb[5].mxu1  ;;  %vm448_vm5 = vcmp.ge.f32.partialorder %v442_v33, 0.0  ;;  %v499_v50 = vadd.f32 %v498_v35, %v459_v48 }
 0x173   : > { %v501_v38 = vpop.f32.mrb[6].mxu1 }
 0x174   : > { %v444_v39 = vsub.f32 0.0, %v443_v36  ;;  %v817_v40 = vpop.f32.mrb[7].mxu1 }
 0x176   : > { %v445_v41 = vmul.f32 1.442695, %v444_v39 }
 0x178   : > { %884 = vpow2.f32 %v445_v41 }
 0x182   : > { %v885_v42 = vpop.eup %884 }
 0x183   : > { %v447_v43 = vmul.f32 %v885_v42, %v885_v42 }
 0x185   : > { %v451_v44 = vadd.f32 1.0, %v447_v43  ;;  %v449_v45 = vsel %vm448_vm5, 1.0, %v447_v43 }
 0x186   : > { %v450_v46 = vsub.f32 %v449_v45, %v885_v42 }
 0x187   : > { %886 = vrcp.f32 %v451_v44 }
 0x191   : > { %v887_v47 = vpop.eup %886 }
 0x192   : > { %v453_v49 = vmul.f32 %v887_v47, %v450_v46 }
 0x194   : > { %v1100_v51 = vadd.f32 %v499_v50, %v453_v49 }
 0x196   : > { %511 = vrot.lane.b32.xlu1 %v1100_v51, %s961_s18  ;;  %506 = vrot.lane.b32.xlu0 %v1100_v51, %s962_s19  ;;  %v516_v52 = vpack.c.bf16 %v1100_v51, %v1100_v51  ;;  %s700_s18 = sshll.u32 %s269_s17, 4  ;;  %s1135_s18 = int_to_ptr.vmem [resolvable:$true] %s700_s18 }
 0x197   : > { %s892_s23 = scalar_lea.vmem %s1135_s18, 128  ;;  %p899_p0 = scmp.lt.s32.totalorder %s1135_s18, %s897_s29 }
 0x198   : > { %v527_v54 = vsel %vm525_vm6, %v516_v52, 0  ;;  %p893_p11 = scmp.ne.s32.totalorder %s1135_s18, %s892_s23  ;;  %p900_p1 = scmp.lt.s32.totalorder %s898_s8, %s892_s23 }
 0x199   : > { %819 = vmatpush3.bf16.msra.mxu0 %v527_v54 }
 0x19a   : > { %830 = vmatprep.subr.bf16.mxu0 %v956_v0  ;;  %668 = vperm.xlu0 %883, %v665_v53   ;;  %p894_p12 = pnand %p893_p11, %p1042_p5  ;;  %p901_p2 = por %p900_p1, %p899_p0 }
 0x19c   : > { %821 = vmatmul.mubr.msk.bf16.vlgmr.msra.gmra.mrb[8].mxu0 %vm521_vm7, %v771_v55  ;;  %p895_p13 = pneg %p894_p12 }
 0x19d   : > { %832 = vmatprep.mubr.msk.bf16.mxu0 %vm957_vm0, %v956_v0  ;;  %v774_v0 = vld [vmem:[%s1180_s5 + $0x8] sm:$0xf] }
 0x19e   : > { %p902_p3 = pnand %p901_p2, %p895_p13 }
 0x208   : > { %v512_v56 = vpop.permute.xlu1 %511  ;;  %v507_v57 = vpop.permute.xlu0 %506 }
 0x209   : > { %v515_v58 = vsel %vm514_vm8, %v512_v56, 0.0  ;;  %v510_v59 = vsel %vm509_vm9, 0.0, %v507_v57 }
 0x20a   : > { %v617_v60 = vpack.c.bf16 %v515_v58, %v515_v58  ;;  %v518_v61 = vpack.c.bf16 %v510_v59, %v510_v59 }
 0x20c   : > { %v622_v62 = vsel %vm525_vm6, %v617_v60, 0  ;;  %v573_v63 = vsel %vm525_vm6, %v518_v61, 0 }
 0x20d   : > { %825 = vmatpush3.bf16.msra.mxu1 %v573_v63  ;;  %831 = vmatpush3.bf16.msra.mxu0 %v622_v62 }
 0x210   : > { %827 = vmatmul.mubr.msk.bf16.vlgmr.msra.gmra.mrb[8].mxu1 %vm521_vm7, %v517_v1  ;;  %833 = vmatmul.mubr.msk.bf16.vlgmr.msra.gmra.mrb[12].mxu0 %vm521_vm7, %v774_v0 }
 0x219   : > { %v669_v6 = vpop.permute.xlu0 %668 }
 0x26f   : > { %v563_v2 = vpop.f32.mrb[8].mxu0 }
 0x270   : > { %v822_v3 = vpop.f32.mrb[9].mxu0 }
 0x271   : > { %v566_v4 = vpop.f32.mrb[10].mxu0 }
 0x272   : > { %v823_v5 = vpop.f32.mrb[11].mxu0 }
 0x2e3   : > { %v609_v7 = vpop.f32.mrb[8].mxu1  ;;  %v658_v8 = vpop.f32.mrb[12].mxu0 }
 0x2e4   : > { %v610_v9 = vadd.f32 %v609_v7, %v563_v2  ;;  %v828_v10 = vpop.f32.mrb[9].mxu1  ;;  %v834_v11 = vpop.f32.mrb[13].mxu0 }
 0x2e5   : > { %v612_v12 = vpop.f32.mrb[10].mxu1  ;;  %v661_v13 = vpop.f32.mrb[14].mxu0 }
 0x2e6   : > { %v664_v14 = vadd.f32 %v658_v8, %v610_v9  ;;  %v829_v15 = vpop.f32.mrb[11].mxu1  ;;  %v835_v16 = vpop.f32.mrb[15].mxu0 }
 0x2e8   : > { %v671_v17 = vadd.f32 %v669_v6, %v664_v14 }
 0x2ea   : > { %v672_v18 = vand.u32 2147483647, %v671_v17  ;;  %vm677_vm10 = vcmp.ge.f32.partialorder %v671_v17, 0.0 }
 0x2ec   : > { %v673_v19 = vsub.f32 0.0, %v672_v18 }
 0x2ee   : > { %v674_v20 = vmul.f32 1.442695, %v673_v19 }
 0x2f0   : > { %888 = vpow2.f32 %v674_v20 }
 0x2fa   : > { %v889_v21 = vpop.eup %888 }
 0x2fb   : > { %v676_v22 = vmul.f32 %v889_v21, %v889_v21 }
 0x2fd   : > { %v680_v23 = vadd.f32 1.0, %v676_v22  ;;  %v678_v24 = vsel %vm677_vm10, 1.0, %v676_v22 }
 0x2fe   : > { %v679_v25 = vsub.f32 %v678_v24, %v889_v21 }
 0x2ff   : > { %890 = vrcp.f32 %v680_v23 }
 0x309   : > { %v891_v26 = vpop.eup %890 }
 0x30a   : > { %v682_v27 = vmul.f32 %v891_v26, %v679_v25 }
 0x30c   : > { %v683_v28 = vadd.f32 %v682_v27, %v1100_v51 }
 0x30e   : > { %685 = vst.msk [vmem:[%s269_s17] sm:$0xff] %vm684_vm11, %v683_v28 }
 0x30f   : > { %905 = shalt.err (!%p902_p3)
}
 0x310   : > { %s906_s9 = scalar_lea.hbm %s1133_s21, 128  ;;  %s910_s15 = scalar_lea.hbm %s1182_s7, 256 }
 0x311   : > { %p907_p4 = scmp.ne.s32.totalorder %s1133_s21, %s906_s9  ;;  %p911_p9 = scmp.lt.u32.totalorder %s1133_s21, %s1182_s7 }
 0x312   : > { %p912_p10 = scmp.lt.u32.totalorder %s910_s15, %s906_s9  ;;  %p914_p12 = scmp.lt.u32.totalorder %s906_s9, %s1133_s21 }
 0x313   : > { %p908_p7 = pnand %p907_p4, %p1042_p5 }
 0x314   : > { %p913_p11 = por %p912_p10, %p911_p9 }
 0x315   : > { %p909_p8 = pneg %p908_p7 }
 0x316   : > { %p915_p13 = por %p914_p12, %p913_p11 }
 0x318   : > { %p916_p0 = pnand %p915_p13, %p909_p8 }
 0x31a   : > { %919 = shalt.err (!%p916_p0)
}
 0x31b   : > { %836 = dma.vmem_to_hbm [thread:$0]  (%p1042_p5), %s1135_s18, 128, %s1133_s21, %s687_s22  }
 0x31c PF: > { %p842_p1 = scmp.ge.s32.totalorder %s954_s27, 2  ;;  %s712_s19 = sand.u32 1, %s942_s24  }
 0x31d   : > { %s713_s20 = scalar_lea.sflag [#allocation3], %s712_s19 }
 0x31e   : > { %p839_p2 = pnand %p842_p1, %p1046_p6 }
 0x320   : > { %937 = dma.done.wait (!%p839_p2), %s713_s20, 128  }
 0x321   : > { %939 = vsyncadd (!%p839_p2), %s713_s20, 4294967168  ;;  %p17_p3 = scmp.ge.s32.totalorder %s1029_s30, 4   ;;  %s1185_s24 = smov %s946_s25 }
 0x322   : > { %s1186_s25 = smov %s950_s26  ;;  %s1187_s26 = smov %s1040_s10 }
 0x323   : > { %s1188_s27 = smov %s1029_s30  ;;  %19 = sbr.rel (!%p17_p3) target bundleno = 3 (0x3), region = 87 }
 0x32a   :  { %718 = vsyncpa [#allocation3], 1 }
 0x32b   :  { %720 = vsyncpa [#allocation3 + $0x1], 1 }

</bundles_post_ra>
